<compile_context>
chip_gen: v6e
topology: v6e:2x2x1
jax: 0.10.0
libtpu: 0.0.40
codegen_flags: <defaults>
</compile_context>

<pallas_src>
import jax
import jax.numpy as jnp
from jax.experimental import pallas as pl
from jax.experimental.pallas import tpu as pltpu


def _round_up(x, m):
    return ((x + m - 1) // m) * m


def _make_dice_sums_kernel(mode, p, dense_target, has_mask, needs_tail, hw, tm):
    """Build the per-tile reduction kernel (all config baked in statically)."""

    def kernel(score_ref, tgt_ref, *rest):
        if has_mask:
            keep_ref, out_ref = rest
        else:
            (out_ref,) = rest

        # out_ref block (C, 3) is resident across the pixel-tile (reduction)
        # axis for a fixed batch index: zero it on the first tile.
        @pl.when(pl.program_id(1) == 0)
        def _():
            out_ref[...] = jnp.zeros_like(out_ref)

        s = score_ref[...].astype(jnp.float32)                 # (C, tm)
        if mode == "softmax":
            s = jax.nn.softmax(s, axis=0)                      # over class dim
        elif mode == "sigmoid":
            s = jax.nn.sigmoid(s)

        # Boolean validity mask: user ignore-mask AND ragged-tail mask.
        valid = None
        if has_mask:
            valid = keep_ref[...] != 0.0                       # (1 or C, tm)
        if needs_tail:
            col = (pl.program_id(1) * tm
                   + jax.lax.broadcasted_iota(jnp.int32, (1, tm), 1))
            tail = col < hw                                    # (1, tm)
            valid = tail if valid is None else (valid & tail)

        # jnp.where (not multiply) so garbage in OOB lanes cannot produce NaNs.
        s_eff = jnp.where(valid, s, 0.0) if valid is not None else s

        if dense_target:
            t = tgt_ref[...].astype(jnp.float32)               # (C, tm)
            t_eff = jnp.where(valid, t, 0.0) if valid is not None else t
            intersect = jnp.sum(s_eff * t_eff, axis=1, keepdims=True)
            if p == 2:
                y = jnp.sum(t_eff * t_eff, axis=1, keepdims=True)
                z = jnp.sum(s_eff * s_eff, axis=1, keepdims=True)
            else:
                y = jnp.sum(t_eff, axis=1, keepdims=True)
                z = jnp.sum(s_eff, axis=1, keepdims=True)
        else:
            # In-kernel one-hot: t[c, m] = (label[m] == c); t is 0/1 so t*t == t.
            lab = tgt_ref[...].astype(jnp.int32)               # (1, tm)
            cls = jax.lax.broadcasted_iota(jnp.int32, s.shape, 0)
            oh = lab == cls                                    # (C, tm) bool
            if valid is not None:
                oh = oh & valid
            intersect = jnp.sum(jnp.where(oh, s_eff, 0.0), axis=1, keepdims=True)
            y = jnp.sum(oh.astype(jnp.float32), axis=1, keepdims=True)
            if p == 2:
                z = jnp.sum(s_eff * s_eff, axis=1, keepdims=True)
            else:
                z = jnp.sum(s_eff, axis=1, keepdims=True)

        # Single accumulator update per tile.
        out_ref[...] += jnp.concatenate([intersect, y, z], axis=1)

    return kernel


def dice_loss(inputs, target, n_classes, p=2, softmax="", ignore=None,
              onehot=True, block_m=65536):
    """Pallas implementation of DiceLoss.forward.

    inputs : (N, C, H, W) scores (any float dtype)
    target : (N, H, W) int labels (onehot=True) or (N, C, H, W) dense target
    ignore : optional (N, H, W) or (N, C, H, W); pixels with value 1 ignored
    """
    if softmax not in ("", "softmax", "sigmoid"):
        raise ValueError("softmax should be softmax or sigmoid or empty")

    N, C, H, W = inputs.shape
    if C != n_classes:
        raise ValueError(f"inputs has {C} channels, expected {n_classes}")
    hw = H * W

    # Free reshape; keeps native dtype & NCHW contiguity (no HBM copy pass).
    score = inputs.reshape(N, C, hw)

    if onehot:
        t = target
        if t.ndim == 4:                    # (N, 1, H, W) -> (N, H, W)
            t = t[:, 0]
        tgt = t.reshape(N, 1, hw).astype(jnp.int32)
        dense_target = False
        t_rows = 1
    else:
        if inputs.shape != target.shape:
            raise ValueError(
                f"predict & target shape do not match: {inputs.shape}, {target.shape}")
        tgt = target.reshape(N, C, hw)
        dense_target = True
        t_rows = C

    if ignore is None:
        keep = None
    elif ignore.ndim == 3:
        keep = (ignore.reshape(N, 1, hw) != 1).astype(jnp.float32)
    else:
        keep = (ignore.reshape(N, C, hw) != 1).astype(jnp.float32)
    has_mask = keep is not None

    # --- tile-size selection (lane axis), 128-aligned, VMEM-budgeted ---------
    tm = min(_round_up(max(int(block_m), 128), 128), _round_up(hw, 128))
    c_sub = _round_up(C, 8)                       # sublane padding in VMEM
    t_sub = c_sub if dense_target else 8
    bytes_per_lane = 2 * (c_sub * score.dtype.itemsize
                          + t_sub * tgt.dtype.itemsize)   # double-buffered
    if has_mask:
        k_sub = c_sub if keep.shape[1] == C else 8
        bytes_per_lane += 2 * k_sub * keep.dtype.itemsize
    vmem_budget = 12 * 1024 * 1024                # fits v5e's 16 MiB scoped default
    tm_cap = max(128, (vmem_budget // bytes_per_lane) // 128 * 128)
    tm = min(tm, tm_cap)

    n_tiles = pl.cdiv(hw, tm)
    needs_tail = (hw % tm) != 0

    kernel = _make_dice_sums_kernel(softmax, p, dense_target, has_mask,
                                    needs_tail, hw, tm)

    in_specs = [
        pl.BlockSpec((pl.Squeezed(), C, tm), lambda n, j: (n, 0, j)),
        pl.BlockSpec((pl.Squeezed(), t_rows, tm), lambda n, j: (n, 0, j)),
    ]
    operands = [score, tgt]
    if has_mask:
        in_specs.append(
            pl.BlockSpec((pl.Squeezed(), keep.shape[1], tm), lambda n, j: (n, 0, j)))
        operands.append(keep)

    sums = pl.pallas_call(
        kernel,
        out_shape=jax.ShapeDtypeStruct((N, C, 3), jnp.float32),
        grid_spec=pltpu.PrefetchScalarGridSpec(
            num_scalar_prefetch=0,
            grid=(N, n_tiles),
            in_specs=in_specs,
            out_specs=pl.BlockSpec((pl.Squeezed(), C, 3), lambda n, j: (n, 0, 0)),
        ),
        compiler_params=pltpu.CompilerParams(
            # batch axis parallel (uses both TCs on v7x), pixel axis = reduction
            dimension_semantics=("parallel", "arbitrary")),
    )(*operands)

    # Tiny glue: pool the per-batch partial sums and form the dice loss.
    smooth = 1e-5
    totals = jnp.sum(sums, axis=0)                # (C, 3)
    intersect, y_sum, z_sum = totals[:, 0], totals[:, 1], totals[:, 2]
    dice = 1.0 - (2.0 * intersect + smooth) / (z_sum + y_sum + smooth)
    return jnp.sum(dice) / n_classes


def _reference_dice_loss(inputs, target, n_classes, p=2, softmax="",
                         ignore=None, onehot=True):
    """Pure-JAX reference mirroring the PyTorch forward."""
    if softmax == "softmax":
        inputs = jax.nn.softmax(inputs, axis=1)
    elif softmax == "sigmoid":
        inputs = jax.nn.sigmoid(inputs)
    if onehot:
        t = target
        if t.ndim == 4:
            t = t[:, 0]
        t = jax.nn.one_hot(t, n_classes, dtype=jnp.float32)
        t = jnp.transpose(t, (0, 3, 1, 2))
    else:
        t = target.astype(jnp.float32)
    if ignore is not None:
        keepm = (ignore != 1)
        if keepm.ndim == 3:
            keepm = keepm[:, None]
        keep = jnp.broadcast_to(keepm, inputs.shape).astype(jnp.float32)
    else:
        keep = jnp.ones_like(inputs, dtype=jnp.float32)
    smooth = 1e-5
    loss = 0.0
    for i in range(n_classes):
        s = inputs[:, i].astype(jnp.float32) * keep[:, i]
        ti = t[:, i] * keep[:, i]
        inter = jnp.sum(s * ti)
        if p == 2:
            y = jnp.sum(ti * ti)
            z = jnp.sum(s * s)
        else:
            y = jnp.sum(ti)
            z = jnp.sum(s)
        loss = loss + (1.0 - (2.0 * inter + smooth) / (z + y + smooth))
    return loss / n_classes


if __name__ == "__main__":
    key = jax.random.PRNGKey(0)
    k1, k2 = jax.random.split(key)

    # Typical usage: probabilities from a segmentation head (softmax='' path).
    N, C, H, W = 2, 4, 16, 16
    logits = jax.random.normal(k1, (N, C, H, W), dtype=jnp.float32)
    inputs = jax.nn.softmax(logits, axis=1)
    target = jax.random.randint(k2, (N, H, W), 0, C, dtype=jnp.int32)

    loss = jax.block_until_ready(
        dice_loss(inputs, target, n_classes=C, p=2, softmax="", ignore=None))
    ref = jax.block_until_ready(_reference_dice_loss(inputs, target, C, p=2))
    assert jnp.allclose(loss, ref, atol=1e-5, rtol=1e-5), (loss, ref)

    # Exercise the in-kernel softmax mode and the ragged (H*W not a multiple
    # of the 128-lane tile) tail-mask path.
    H2 = W2 = 18
    logits2 = jax.random.normal(k1, (N, C, H2, W2), dtype=jnp.float32)
    target2 = jax.random.randint(k2, (N, H2, W2), 0, C, dtype=jnp.int32)
    loss2 = jax.block_until_ready(
        dice_loss(logits2, target2, n_classes=C, p=2, softmax="softmax"))
    ref2 = jax.block_until_ready(
        _reference_dice_loss(logits2, target2, C, p=2, softmax="softmax"))
    assert jnp.allclose(loss2, ref2, atol=1e-5, rtol=1e-5), (loss2, ref2)

    print("KERNEL_OK")
</pallas_src>

<mosaic_0001>
module attributes {stable_mosaic.version = 11 : i64} {
  func.func @kernel(%arg0: i32, %arg1: i32, %arg2: memref<1x4x256xf32, #tpu.memory_space<vmem>>, %arg3: memref<1x1x256xi32, #tpu.memory_space<vmem>>, %arg4: memref<1x4x3xf32, #tpu.memory_space<vmem>>) attributes {dimension_semantics = [#tpu.dimension_semantics<parallel>, #tpu.dimension_semantics<arbitrary>], iteration_bounds = array<i64: 2, 1>, scalar_prefetch = 0 : i64, scratch_operands = 0 : i64, tpu.core_type = #tpu.core_type<tc>, window_params = [{transform_indices = @transform_0, window_bounds = array<i64: 1, 4, 256>}, {transform_indices = @transform_1, window_bounds = array<i64: 1, 1, 256>}, {transform_indices = @transform_2, window_bounds = array<i64: 1, 4, 3>}]} {
    %c0_i32 = arith.constant 0 : i32
    %0 = arith.cmpi eq, %arg1, %c0_i32 : i32
    %1 = arith.extui %0 : i1 to i32
    %c0_i32_0 = arith.constant 0 : i32
    %2 = arith.cmpi ne, %1, %c0_i32_0 : i32
    scf.if %2 {
      %cst_15 = arith.constant 0.000000e+00 : f32
      %28 = vector.broadcast %cst_15 : f32 to vector<4x3xf32>
      %c0_16 = arith.constant 0 : index
      %c0_17 = arith.constant 0 : index
      %c0_18 = arith.constant 0 : index
      %29 = vector.load %arg4[%c0_16, %c0_17, %c0_18] : memref<1x4x3xf32, #tpu.memory_space<vmem>>, vector<1x4x3xf32>
      %30 = vector.shape_cast %29 : vector<1x4x3xf32> to vector<4x3xf32>
      %31 = vector.shape_cast %28 : vector<4x3xf32> to vector<1x4x3xf32>
      tpu.vector_store %arg4[%c0_16, %c0_17, %c0_18], %31 {strides = array<i32>} : memref<1x4x3xf32, #tpu.memory_space<vmem>>, vector<1x4x3xf32>,
    } else {
    }
    %c0 = arith.constant 0 : index
    %c0_1 = arith.constant 0 : index
    %c0_2 = arith.constant 0 : index
    %3 = vector.load %arg2[%c0, %c0_1, %c0_2] : memref<1x4x256xf32, #tpu.memory_space<vmem>>, vector<1x4x256xf32>
    %4 = vector.shape_cast %3 : vector<1x4x256xf32> to vector<4x256xf32>
    %c0_3 = arith.constant 0 : index
    %c0_4 = arith.constant 0 : index
    %c0_5 = arith.constant 0 : index
    %5 = vector.load %arg3[%c0_3, %c0_4, %c0_5] : memref<1x1x256xi32, #tpu.memory_space<vmem>>, vector<1x1x256xi32>
    %6 = vector.shape_cast %5 : vector<1x1x256xi32> to vector<1x256xi32>
    %7 = tpu.iota {dimensions = array<i32: 0>} : vector<4x256xi32>
    %8 = vector.broadcast %6 : vector<1x256xi32> to vector<4x256xi32>
    %9 = arith.cmpi eq, %8, %7 : vector<4x256xi32>
    %cst = arith.constant 0.000000e+00 : f32
    %10 = vector.broadcast %cst : f32 to vector<4x256xf32>
    %11 = arith.select %9, %4, %10 : vector<4x256xi1>, vector<4x256xf32>
    %cst_6 = arith.constant dense<0.000000e+00> : vector<4xf32>
    %12 = vector.multi_reduction <add>, %11, %cst_6 [1] : vector<4x256xf32> to vector<4xf32>
    %13 = vector.shape_cast %12 : vector<4xf32> to vector<4x1xf32>
    %14 = arith.extui %9 : vector<4x256xi1> to vector<4x256xi32>
    %15 = arith.sitofp %14 : vector<4x256xi32> to vector<4x256xf32>
    %cst_7 = arith.constant dense<0.000000e+00> : vector<4xf32>
    %16 = vector.multi_reduction <add>, %15, %cst_7 [1] : vector<4x256xf32> to vector<4xf32>
    %17 = vector.shape_cast %16 : vector<4xf32> to vector<4x1xf32>
    %18 = arith.mulf %4, %4 : vector<4x256xf32>
    %cst_8 = arith.constant dense<0.000000e+00> : vector<4xf32>
    %19 = vector.multi_reduction <add>, %18, %cst_8 [1] : vector<4x256xf32> to vector<4xf32>
    %20 = vector.shape_cast %19 : vector<4xf32> to vector<4x1xf32>
    %c0_9 = arith.constant 0 : index
    %c0_10 = arith.constant 0 : index
    %c0_11 = arith.constant 0 : index
    %21 = vector.load %arg4[%c0_9, %c0_10, %c0_11] : memref<1x4x3xf32, #tpu.memory_space<vmem>>, vector<1x4x3xf32>
    %22 = vector.shape_cast %21 : vector<1x4x3xf32> to vector<4x3xf32>
    %23 = tpu.concatenate %13, %17, %20 in 1 : vector<4x1xf32>, vector<4x1xf32>, vector<4x1xf32> -> vector<4x3xf32>
    %24 = arith.addf %22, %23 : vector<4x3xf32>
    %c0_12 = arith.constant 0 : index
    %c0_13 = arith.constant 0 : index
    %c0_14 = arith.constant 0 : index
    %25 = vector.load %arg4[%c0_12, %c0_13, %c0_14] : memref<1x4x3xf32, #tpu.memory_space<vmem>>, vector<1x4x3xf32>
    %26 = vector.shape_cast %25 : vector<1x4x3xf32> to vector<4x3xf32>
    %27 = vector.shape_cast %24 : vector<4x3xf32> to vector<1x4x3xf32>
    tpu.vector_store %arg4[%c0_12, %c0_13, %c0_14], %27 {strides = array<i32>} : memref<1x4x3xf32, #tpu.memory_space<vmem>>, vector<1x4x3xf32>,
    return
  }
  func.func @transform_0(%arg0: i32, %arg1: i32) -> (i32, i32, i32) {
    %c0_i32 = arith.constant 0 : i32
    %c0_i32_0 = arith.constant 0 : i32
    return %arg0, %c0_i32, %arg1 : i32, i32, i32
  }
  func.func @transform_1(%arg0: i32, %arg1: i32) -> (i32, i32, i32) {
    %c0_i32 = arith.constant 0 : i32
    %c0_i32_0 = arith.constant 0 : i32
    return %arg0, %c0_i32, %arg1 : i32, i32, i32
  }
  func.func @transform_2(%arg0: i32, %arg1: i32) -> (i32, i32, i32) {
    %c0_i32 = arith.constant 0 : i32
    %c0_i32_0 = arith.constant 0 : i32
    %c0_i32_1 = arith.constant 0 : i32
    return %arg0, %c0_i32, %c0_i32_0 : i32, i32, i32
  }
}

</mosaic_0001>

<bundles_post_ra>
// kernel: tpu_custom_call.1
= control target key start
LH: loop header
LB: loop body
LE: loop exit
PB: predicated region body
PF: predicated region fallthrough
CT: control target
= control target key end

     0   :  { %7 = vsyncpa [#allocation3], 0  ;;  %s726_s0 = inlined_call_operand.hbm [shape: f32[2,4,256], index: 0, kind: input, shape index: {}]   ;;  %s727_s1 = inlined_call_operand.hbm [shape: s32[2,1,256], index: 1, kind: input, shape index: {}]   ;;  %s728_s2 = inlined_call_operand.vmem [shape: f32[2,4,3], index: 2, kind: output, shape index: {}]  }
   0x1   :  { %9 = vsyncpa [#allocation3 + $0x1], 0 }
   0x2   :  { %10 = vsyncpa [#allocation5], 0 }
   0x3   :  { %12 = vsyncpa [#allocation5 + $0x1], 0  ;;  %s591_s9 = smov 0   ;;  %s593_s10 = smov 0  }
   0x4   :  { %s595_s11 = smov 0   ;;  %s597_s12 = smov 0  }
   0x5   :  { %s599_s13 = smov 0   ;;  %s601_s14 = smov 0  }
   0x6 LB: > { %s379_s15 = sadd.s32 4294967295, %s571_s14   ;;  %s30_s16 = sadd.s32 1, %s567_s13  ;;  %s571_s14 = sphi %s601_s14, %s18_s14   ;;  %s567_s13 = sphi %s599_s13, %s737_s13   ;;  %s563_s12 = sphi %s597_s12, %s736_s12   ;;  %s559_s11 = sphi %s595_s11, %s735_s11   ;;  %s555_s10 = sphi %s593_s10, %s734_s10   ;;  %s551_s9 = sphi %s591_s9, %s733_s9  }
   0x7   : > { %p32_p0 = scmp.ge.s32.totalorder %s30_s16, 2  ;;  %s39_s17 = sadd.s32 1, %s559_s11 }
   0x8   : > { %p46_p1 = scmp.ne.s32.totalorder %s559_s11, %s555_s10  ;;  %p47_p2 = scmp.eq.s32.totalorder %s571_s14, 0 }
   0x9   : > { %s739_s16 = smov (%p32_p0, %s30_s16), 0  ;;  %p52_p4 = scmp.ne.s32.totalorder %s555_s10, %s551_s9 }
   0xa   : > { %p627_p3 = por %p47_p2, %p46_p1  ;;  %s34_s19 = ssub.s32 %s567_s13, %s739_s16 }
   0xb   : > { %p53_p5 = scmp.eq.s32.totalorder %s379_s15, 0  ;;  %p37_p6 = scmp.eq.s32.totalorder %s34_s19, 0 }
   0xc   : > { %p410_p8 = scmp.lt.s32.totalorder %s571_s14, 2  ;;  %s643_s22 = sand.u32 1, %s559_s11  }
   0xd   : > { %p634_p7 = por %p53_p5, %p52_p4  ;;  %s397_s23 = sshll.u32 %s567_s13, 7 }
   0xe   : > { %s640_s21 = scalar_select %p37_p6, %s559_s11, %s39_s17  }
   0xf   : > { %s383_s24 = sshll.u32 %s643_s22, 3  ;;  %s142_s27 = scalar_lea.hbm %s726_s0, %s397_s23 }
  0x10   : > { %s134_s28 = scalar_lea.vmem [#allocation2], %s383_s24  ;;  %p652_p9 = pnand %p410_p8, %p627_p3 }
  0x11   : > { %s144_s29 = sshll.u32 %s134_s28, 4  ;;  %p389_p10 = scmp.ge.s32.totalorder %s571_s14, 1  ;;  %s145_s29 = int_to_ptr.vmem [resolvable:$true] %s144_s29 }
  0x12   : > { %p170_p11 = scmp.lt.s32.totalorder %s571_s14, 3  ;;  %s131_s3 = scalar_lea.sflag [#allocation3], %s643_s22 }
  0x13   : > { %p463_p12 = pneg %p652_p9  ;;  %s474_s4 = scalar_lea.vmem %s145_s29, 128 }
  0x14   : > { %p475_p13 = scmp.ne.s32.totalorder %s145_s29, %s474_s4  ;;  %s573_s5 = smov [#allocation2]  }
  0x15   : > { %s479_s6 = sshll.u32 %s573_s5, 4  ;;  %s480_s6 = int_to_ptr.vmem [resolvable:$false] %s479_s6 }
  0x16   : > { %p477_p0 = pnand %p475_p13, %p463_p12  ;;  %s481_s7 = scalar_lea.vmem %s480_s6, 256 }
  0x17   : > { %p482_p2 = scmp.lt.s32.totalorder %s145_s29, %s480_s6  ;;  %p483_p3 = scmp.lt.s32.totalorder %s481_s7, %s474_s4 }
  0x18   : > { %p478_p1 = pneg %p477_p0 }
  0x19   : > { %p484_p4 = por %p483_p3, %p482_p2 }
  0x1b   : > { %p485_p5 = pnand %p484_p4, %p478_p1 }
  0x1d   : > { %488 = shalt.err (!%p485_p5)
}
  0x1e   : > { %406 = dma.hbm_to_vmem [thread:$0]  (!%p652_p9), %s142_s27, 128, %s145_s29, %s131_s3  }
  0x1f   : > { %p670_p6 = pnand %p389_p10, %p170_p11  ;;  %s386_s9 = sshll.u32 %s643_s22, 1 }
  0x20   : > { %s398_s15 = sshll.u32 %s567_s13, 5  ;;  %s155_s23 = scalar_lea.vmem [#allocation4], %s386_s9 }
  0x21   : > { %s163_s19 = scalar_lea.hbm %s727_s1, %s398_s15  ;;  %s165_s24 = sshll.u32 %s155_s23, 4  ;;  %s166_s24 = int_to_ptr.vmem [resolvable:$true] %s165_s24 }
  0x22   : > { %s152_s25 = scalar_lea.sflag [#allocation5], %s643_s22  ;;  %s502_s26 = scalar_lea.vmem %s166_s24, 32 }
  0x23   : > { %p503_p8 = scmp.ne.s32.totalorder %s166_s24, %s502_s26  ;;  %s574_s27 = smov [#allocation4]  }
  0x24   : > { %s507_s28 = sshll.u32 %s574_s27, 4  ;;  %s508_s28 = int_to_ptr.vmem [resolvable:$false] %s507_s28 }
  0x25   : > { %p505_p13 = pnand %p503_p8, %p463_p12  ;;  %s509_s29 = scalar_lea.vmem %s508_s28, 64 }
  0x26   : > { %p510_p10 = scmp.lt.s32.totalorder %s166_s24, %s508_s28  ;;  %p511_p11 = scmp.lt.s32.totalorder %s509_s29, %s502_s26 }
  0x27   : > { %p506_p0 = pneg %p505_p13 }
  0x28   : > { %p512_p1 = por %p511_p11, %p510_p10 }
  0x2a   : > { %p513_p2 = pnand %p512_p1, %p506_p0 }
  0x2c   : > { %516 = shalt.err (!%p513_p2)
}
  0x2d   : > { %409 = dma.hbm_to_vmem [thread:$0]  (!%p652_p9), %s163_s19, 32, %s166_s24, %s152_s25  }
  0x2e   : > { %174 = sbr.rel (%p670_p6) target bundleno = 215 (0xd7), region = 28  ;;  %s176_s22 = sand.u32 (!%p670_p6), 1, %s555_s10  }
  0x2f   : > { %s390_s3 = sshll.u32 (!%p670_p6), %s176_s22, 3  ;;  %s177_s4 = scalar_lea.sflag (!%p670_p6), [#allocation3], %s176_s22 }
  0x30   : > { %s180_s5 = scalar_lea.vmem (!%p670_p6), [#allocation2], %s390_s3 }
  0x33   : > { %542 = dma.done.wait (%p634_p7), %s177_s4, 128  }
  0x34   : > { %544 = vsyncadd (%p634_p7), %s177_s4, 4294967168  ;;  %s391_s6 = sshll.u32 %s176_s22, 1  ;;  %s186_s7 = scalar_lea.sflag [#allocation5], %s176_s22 }
  0x35   : > { %s189_s9 = scalar_lea.vmem [#allocation4], %s391_s6 }
  0x36   : > { %546 = dma.done.wait (%p634_p7), %s186_s7, 32  }
  0x37   : > { %548 = vsyncadd (%p634_p7), %s186_s7, 4294967264  ;;  %p216_p9 = scmp.lt.s32.totalorder %s563_s12, 1  ;;  %v228_v0 = vlaneseq  ;;  %vm224_vm0 = vcmask 19456   ;;  %v575_v4 = vmov 0.0   ;;  %v226_v5 = vld [vmem:[%s180_s5] sm:$0xff]  ;;  %vm245_vm1 = vcmask 1043456  }
  0x38   : > { %v227_v6 = vld [vmem:[%s189_s9] sm:$0x3]  ;;  %v241_v9 = vcombine.high %v226_v5, %v226_v5  ;;  %v260_v10 = vmul.f32 %v226_v5, %v226_v5  ;;  %vm270_vm4 = vcmask 7168   ;;  %vm272_vm5 = vcmask 15360  }
  0x39   : > { %s741_s12 = smov (!%p216_p9, %s563_s12), 1  ;;  %v229_v1 = vshrl.u32 %v228_v0, 7 }
  0x3a   : > { %s392_s30 = sshll.u32 %s741_s12, 2  ;;  %v262_v11 = vcombine.high %v260_v10, %v260_v10  ;;  %v264_v12 = vsel %vm245_vm1, %v260_v10, 0.0 }
  0x3b   : > { %v232_v2 = vsub.s32 0, %v229_v1  ;;  %v236_v3 = vsub.s32 1, %v229_v1  ;;  %s701_s17 = scalar_lea.vmem %s728_s2, %s392_s30 }
  0x3c   : > { %225 = vst.msk [vmem:[%s701_s17] sm:$0xf] %vm224_vm0, %v575_v4  ;;  %v265_v22 = vsel %vm245_vm1, %v262_v11, 0.0 }
  0x3d   : > { %v233_v7 = vrot.slane %v227_v6, %v232_v2  ;;  %v237_v8 = vrot.slane %v227_v6, %v236_v3  ;;  %v266_v23 = vadd.f32 %v265_v22, %v264_v12 }
  0x3f   : > { %vm238_vm2 = vcmp.eq.s32.totalorder %v233_v7, %v229_v1  ;;  %vm239_vm3 = vcmp.eq.s32.totalorder %v237_v8, %v229_v1  ;;  %267 = vadd.xlane.f32.xlu1 %v266_v23 }
  0x40   : > { %v243_v13 = vsel %vm238_vm2, %v226_v5, 0.0  ;;  %v244_v14 = vsel %vm239_vm3, %v241_v9, 0.0  ;;  %v393_v15 = vsel %vm238_vm2, 1.0, %v575_v4  ;;  %v394_v16 = vsel %vm239_vm3, 1.0, %v575_v4 }
  0x41   : > { %v246_v17 = vsel %vm245_vm1, %v243_v13, 0.0  ;;  %v247_v18 = vsel %vm245_vm1, %v244_v14, 0.0  ;;  %v255_v19 = vsel %vm245_vm1, %v393_v15, 0.0  ;;  %v256_v20 = vsel %vm245_vm1, %v394_v16, 0.0 }
  0x42   : > { %v248_v21 = vadd.f32 %v247_v18, %v246_v17  ;;  %v257_v24 = vadd.f32 %v256_v20, %v255_v19 }
  0x43   : > { %v269_v28 = vld [vmem:[%s701_s17] sm:$0xf] }
  0x44   : > { %249 = vadd.xlane.f32.xlu0 %v248_v21 }
  0x48   : > { %258 = vadd.xlane.f32.xlu0 %v257_v24 }
  0xc8   : > { %v268_v26 = vpop.xlane.xlu1 %267 }
  0xcd   : > { %v250_v25 = vpop.xlane.xlu0 %249 }
  0xd1   : > { %v259_v27 = vpop.xlane.xlu0 %258 }
  0xd2   : > { %v271_v29 = vsel %vm270_vm4, %v250_v25, %v259_v27 }
  0xd3   : > { %v273_v30 = vsel %vm272_vm5, %v271_v29, %v268_v26 }
  0xd4   : > { %v274_v31 = vadd.f32 %v273_v30, %v269_v28 }
  0xd6   : > { %276 = vst.msk [vmem:[%s701_s17] sm:$0xf] %vm224_vm0, %v274_v31 }
  0xd7 PF: > { %s18_s14 = sadd.s32 1, %s571_s14   ;;  %s733_s9 = smov %s555_s10 }
  0xd8   : > { %p15_p7 = scmp.ge.s32.totalorder %s18_s14, 4   ;;  %s734_s10 = smov %s559_s11 }
  0xd9   : > { %s735_s11 = smov %s640_s21  ;;  %s736_s12 = smov %s567_s13 }
  0xda   : > { %s737_s13 = smov %s739_s16  ;;  %17 = sbr.rel (!%p15_p7) target bundleno = 6 (0x6), region = 85 }
  0xdf   :  { %296 = vsyncpa [#allocation3], 1 }
  0xe0   :  { %298 = vsyncpa [#allocation3 + $0x1], 1 }
  0xe1   :  { %299 = vsyncpa [#allocation5], 1 }
  0xe2   :  { %301 = vsyncpa [#allocation5 + $0x1], 1 }

</bundles_post_ra>
